<compile_context>
chip_gen: v7x
topology: tpu7x:2x2x1
jax: 0.10.0
libtpu: 0.0.40
codegen_flags: <defaults>
</compile_context>

<pallas_src>
import functools

import jax
import jax.numpy as jnp
import numpy as np
from jax import lax
from jax.experimental import pallas as pl
from jax.experimental.pallas import tpu as pltpu


def _sru_stack_kernel(x_ref, w_ref, b_ref, out_ref, *, batch):
    """Fused multi-layer SRU forward, fully VMEM resident.

    x_ref:   (L*B, D)            f32   time-major rows: row i = t*B + b
    w_ref:   (NL, 3, D, H)       bf16  gate-major weights [candidate, forget, reset]
    b_ref:   (NL, 2, 1, H)       f32   [forget_bias, reset_bias (incl. highway_bias)]
    out_ref: (L*B*H // 128, 128) f32   lane-dense folded output slab
    """
    LB, _ = x_ref.shape
    NL = w_ref.shape[0]
    H = w_ref.shape[-1]
    rows, lanes = out_ref.shape
    groups = lanes // H            # how many (rows, H) pieces share one 128-lane row
    f32 = jnp.float32

    # ---- 0/1 shift matrices for the log-depth recurrence scan ---------------
    # (S_d @ A)[i] = A[i - d]  (zero fill for i < d).  Built once from 2-D
    # iotas and reused by every layer.  Doing the shift on the MXU keeps the
    # scan free of per-timestep sub-vreg slices / unaligned concatenates.
    row_i = lax.broadcasted_iota(jnp.int32, (LB, LB), 0)
    col_i = lax.broadcasted_iota(jnp.int32, (LB, LB), 1)
    shift_mats = []
    d = batch
    while d < LB:
        shift_mats.append(jnp.where(col_i == row_i - d, 1.0, 0.0).astype(f32))
        d *= 2

    h = x_ref[...]                                    # (LB, D) f32 layer input

    for layer in range(NL):                           # static unroll (NL == 2)
        # -- bulk, non-recurrent work (hoisted out of the recurrence) ---------
        # bf16 operands for the MXU, f32 accumulation; gate-major weights so
        # no lane-offset slicing of a fused (LB, 3H) U is needed.
        h_bf = h.astype(jnp.bfloat16)
        u_c = jnp.dot(h_bf, w_ref[layer, 0], preferred_element_type=f32)
        u_f = jnp.dot(h_bf, w_ref[layer, 1], preferred_element_type=f32)
        u_r = jnp.dot(h_bf, w_ref[layer, 2], preferred_element_type=f32)

        f = jax.nn.sigmoid(u_f + b_ref[layer, 0])     # (LB, H) forget gate
        r = jax.nn.sigmoid(u_r + b_ref[layer, 1])     # (LB, H) reset/highway gate
        k1 = (1.0 - f) * u_c                          # recurrence input
        k2 = (1.0 - r) * h                            # skip/highway term (D == H)

        # -- serial part: c[i] = f[i] * c[i - batch] + k1[i],  c_init = 0 -----
        # Linear first-order recurrence -> log-depth (Hillis-Steele) scan over
        # rows (stride doubles each step).  After the loop K holds c for every
        # (t, b) row; no L-long dependent chain, no per-timestep slicing.
        F, K = f, k1
        for S in shift_mats:
            K = F * jnp.dot(S, K, preferred_element_type=f32) + K
            F = F * jnp.dot(S, F, preferred_element_type=f32)

        # -- bulk epilogue: activation + highway, feeds the next layer --------
        h = r * jnp.tanh(K) + k2                      # (LB, H)

    # ---- lane-dense output store --------------------------------------------
    # Fold (LB, H) -> (rows, groups*H = 128): folded[r, g*H:(g+1)*H] = h[g*rows + r].
    # The fold uses exact 0/1 placement matmuls (otherwise-idle MXU) instead of
    # sub-128-lane concatenates/reshapes, so the only store into out_ref is a
    # single unmasked, 128-lane-dense store (no vst.msk partial stores).
    sel_r = lax.broadcasted_iota(jnp.int32, (rows, LB), 0)
    sel_c = lax.broadcasted_iota(jnp.int32, (rows, LB), 1)
    put_r = lax.broadcasted_iota(jnp.int32, (H, lanes), 0)
    put_c = lax.broadcasted_iota(jnp.int32, (H, lanes), 1)
    folded = jnp.zeros((rows, lanes), f32)
    for g in range(groups):
        sel = jnp.where(sel_c == sel_r + g * rows, 1.0, 0.0).astype(f32)  # (rows, LB)
        put = jnp.where(put_c == put_r + g * H, 1.0, 0.0).astype(f32)     # (H, lanes)
        piece = jnp.dot(sel, h, preferred_element_type=f32)               # (rows, H)
        folded = folded + jnp.dot(piece, put, preferred_element_type=f32)
    out_ref[...] = folded.astype(out_ref.dtype)


def sru_forward(x, w_stack, b_stack):
    """Run the fused SRU stack through a single pallas_call.

    x:       (L, B, D) f32
    w_stack: (NL, 3, D, H) bf16, gate-major [candidate, forget, reset]
    b_stack: (NL, 2, 1, H) f32,  [forget_bias, reset_bias]
    returns  (L, B, H) f32
    """
    L, B, D = x.shape
    NL, n_gates, d_in, H = w_stack.shape
    assert n_gates == 3 and d_in == D and D == H, "k=3 layout needs inp_dim == hidden"
    LB = L * B
    LANES = 128
    assert LANES % H == 0 and LB % (LANES // H) == 0, "output must fold to 128 lanes"
    groups = LANES // H
    rows = LB // groups

    # TODO(synk): when scaling up (long L, many streams), batch several
    # sequences into one call, add a time-chunk grid axis ("arbitrary", carry c
    # in VMEM scratch) plus a "parallel" batch axis for v7x's two TensorCores,
    # and size the chunk against v7x's 64 MiB VMEM via
    # pltpu.CompilerParams(vmem_limit_bytes=...).
    folded = pl.pallas_call(
        functools.partial(_sru_stack_kernel, batch=B),
        out_shape=jax.ShapeDtypeStruct((rows, LANES), jnp.float32),
        in_specs=[
            pl.BlockSpec(memory_space=pltpu.MemorySpace.VMEM),   # x (folded to 2-D)
            pl.BlockSpec(memory_space=pltpu.MemorySpace.VMEM),   # stacked bf16 weights
            pl.BlockSpec(memory_space=pltpu.MemorySpace.VMEM),   # stacked biases
        ],
        out_specs=pl.BlockSpec(memory_space=pltpu.MemorySpace.VMEM),
    )(x.reshape(LB, D), w_stack, b_stack)

    # Wrapper-side layout plumbing: unfold the lane-dense slab back to (L, B, H).
    # Kernel mapping: folded[r, g*H:(g+1)*H] == h2d[g*rows + r].
    h2d = folded.reshape(rows, groups, H).transpose(1, 0, 2).reshape(LB, H)
    return h2d.reshape(L, B, H)


def init_params(key, num_layers, inp_dim, hidden, highway_bias):
    """Deterministic init mimicking sru's reset_parameters.

    weight ~ U(-sqrt(3/d_in), sqrt(3/d_in)), stored bf16 and gate-major;
    biases zero, with highway_bias added to the *reset/highway* gate bias
    (torch sru fills bias[n_out:], i.e. the reset half, with highway_bias).
    """
    assert inp_dim == hidden, "stacked-weight layout assumes inp_dim == hidden"
    ws, bs = [], []
    d = inp_dim
    for _ in range(num_layers):
        key, kw = jax.random.split(key)
        val = (3.0 / d) ** 0.5
        w = jax.random.uniform(kw, (3, d, hidden), jnp.float32, -val, val)
        ws.append(w.astype(jnp.bfloat16))
        bias = jnp.zeros((2, 1, hidden), jnp.float32)
        bias = bias.at[1].add(highway_bias)           # reset/highway gate bias
        bs.append(bias)
        d = hidden
    return jnp.stack(ws, axis=0), jnp.stack(bs, axis=0)


def sru_ref(x, w_stack, b_stack):
    """Pure-JAX reference (lax.scan) with the same numerics (bf16 matmul operands)."""
    h = x
    NL = w_stack.shape[0]
    H = w_stack.shape[-1]
    for layer in range(NL):
        L, B, _ = h.shape
        u = jnp.einsum("lbd,gdh->glbh", h.astype(jnp.bfloat16), w_stack[layer],
                       preferred_element_type=jnp.float32)
        u_c, u_f, u_r = u[0], u[1], u[2]
        f = jax.nn.sigmoid(u_f + b_stack[layer, 0])
        r = jax.nn.sigmoid(u_r + b_stack[layer, 1])

        def step(c, inp):
            f_t, uc_t, r_t, x_t = inp
            c_new = f_t * c + (1.0 - f_t) * uc_t
            h_t = r_t * jnp.tanh(c_new) + (1.0 - r_t) * x_t
            return c_new, h_t

        c0 = jnp.zeros((B, H), jnp.float32)
        _, hs = lax.scan(step, c0, (f, u_c, r, h))
        h = hs
    return h


if __name__ == "__main__":
    # Small shapes consistent with the module: seq=8, batch=2, inp_dim=hidden=32.
    L, B, D, H, NUM_LAYERS = 8, 2, 32, 32, 2
    HIGHWAY_BIAS = -1.0

    key = jax.random.PRNGKey(0)
    key, kx = jax.random.split(key)
    x = jax.random.normal(kx, (L, B, D), dtype=jnp.float32)
    w_stack, b_stack = init_params(key, NUM_LAYERS, D, H, HIGHWAY_BIAS)

    out = jax.jit(sru_forward)(x, w_stack, b_stack)
    out = jax.block_until_ready(out)
    assert out.shape == (L, B, H), out.shape

    ref = sru_ref(x, w_stack, b_stack)
    if not np.allclose(np.asarray(out), np.asarray(ref), atol=5e-3, rtol=5e-3):
        raise AssertionError("Pallas SRU output does not match the JAX reference")

    print("KERNEL_OK")
</pallas_src>

<mosaic_0001>
module attributes {stable_mosaic.version = 11 : i64} {
  func.func @_sru_stack_kernel(%arg0: memref<16x32xf32, #tpu.memory_space<vmem>>, %arg1: memref<2x3x32x32xbf16, #tpu.memory_space<vmem>>, %arg2: memref<2x2x1x32xf32, #tpu.memory_space<vmem>>, %arg3: memref<4x128xf32, #tpu.memory_space<vmem>>) attributes {dimension_semantics = [], scalar_prefetch = 0 : i64, scratch_operands = 0 : i64, tpu.core_type = #tpu.core_type<tc>} {
    %0 = tpu.iota {dimensions = array<i32: 0>} : vector<16x16xi32>
    %1 = tpu.iota {dimensions = array<i32: 1>} : vector<16x16xi32>
    %c2_i32 = arith.constant 2 : i32
    %2 = vector.broadcast %c2_i32 : i32 to vector<16x16xi32>
    %3 = arith.subi %0, %2 : vector<16x16xi32>
    %4 = arith.cmpi eq, %1, %3 : vector<16x16xi32>
    %cst = arith.constant 1.000000e+00 : f32
    %cst_0 = arith.constant 0.000000e+00 : f32
    %5 = vector.broadcast %cst : f32 to vector<16x16xf32>
    %6 = vector.broadcast %cst_0 : f32 to vector<16x16xf32>
    %7 = arith.select %4, %5, %6 : vector<16x16xi1>, vector<16x16xf32>
    %c4_i32 = arith.constant 4 : i32
    %8 = vector.broadcast %c4_i32 : i32 to vector<16x16xi32>
    %9 = arith.subi %0, %8 : vector<16x16xi32>
    %10 = arith.cmpi eq, %1, %9 : vector<16x16xi32>
    %cst_1 = arith.constant 1.000000e+00 : f32
    %cst_2 = arith.constant 0.000000e+00 : f32
    %11 = vector.broadcast %cst_1 : f32 to vector<16x16xf32>
    %12 = vector.broadcast %cst_2 : f32 to vector<16x16xf32>
    %13 = arith.select %10, %11, %12 : vector<16x16xi1>, vector<16x16xf32>
    %c8_i32 = arith.constant 8 : i32
    %14 = vector.broadcast %c8_i32 : i32 to vector<16x16xi32>
    %15 = arith.subi %0, %14 : vector<16x16xi32>
    %16 = arith.cmpi eq, %1, %15 : vector<16x16xi32>
    %cst_3 = arith.constant 1.000000e+00 : f32
    %cst_4 = arith.constant 0.000000e+00 : f32
    %17 = vector.broadcast %cst_3 : f32 to vector<16x16xf32>
    %18 = vector.broadcast %cst_4 : f32 to vector<16x16xf32>
    %19 = arith.select %16, %17, %18 : vector<16x16xi1>, vector<16x16xf32>
    %c0 = arith.constant 0 : index
    %c0_5 = arith.constant 0 : index
    %20 = vector.load %arg0[%c0, %c0_5] : memref<16x32xf32, #tpu.memory_space<vmem>>, vector<16x32xf32>
    %21 = arith.truncf %20 : vector<16x32xf32> to vector<16x32xbf16>
    %c0_6 = arith.constant 0 : index
    %c0_7 = arith.constant 0 : index
    %c0_8 = arith.constant 0 : index
    %c0_9 = arith.constant 0 : index
    %22 = vector.load %arg1[%c0_6, %c0_7, %c0_8, %c0_9] : memref<2x3x32x32xbf16, #tpu.memory_space<vmem>>, vector<1x1x32x32xbf16>
    %23 = vector.shape_cast %22 : vector<1x1x32x32xbf16> to vector<32x32xbf16>
    %cst_10 = arith.constant dense<0.000000e+00> : vector<16x32xf32>
    %24 = tpu.matmul %21, %23, %cst_10 {dimension_numbers = #tpu.dot_dimension_numbers<[1], [0], [0], [1], [0, 0, 1, 1], [], []>} : vector<16x32xbf16>, vector<32x32xbf16>, vector<16x32xf32> -> vector<16x32xf32>
    %c0_11 = arith.constant 0 : index
    %c1 = arith.constant 1 : index
    %c0_12 = arith.constant 0 : index
    %c0_13 = arith.constant 0 : index
    %25 = vector.load %arg1[%c0_11, %c1, %c0_12, %c0_13] : memref<2x3x32x32xbf16, #tpu.memory_space<vmem>>, vector<1x1x32x32xbf16>
    %26 = vector.shape_cast %25 : vector<1x1x32x32xbf16> to vector<32x32xbf16>
    %cst_14 = arith.constant dense<0.000000e+00> : vector<16x32xf32>
    %27 = tpu.matmul %21, %26, %cst_14 {dimension_numbers = #tpu.dot_dimension_numbers<[1], [0], [0], [1], [0, 0, 1, 1], [], []>} : vector<16x32xbf16>, vector<32x32xbf16>, vector<16x32xf32> -> vector<16x32xf32>
    %c0_15 = arith.constant 0 : index
    %c2 = arith.constant 2 : index
    %c0_16 = arith.constant 0 : index
    %c0_17 = arith.constant 0 : index
    %28 = vector.load %arg1[%c0_15, %c2, %c0_16, %c0_17] : memref<2x3x32x32xbf16, #tpu.memory_space<vmem>>, vector<1x1x32x32xbf16>
    %29 = vector.shape_cast %28 : vector<1x1x32x32xbf16> to vector<32x32xbf16>
    %cst_18 = arith.constant dense<0.000000e+00> : vector<16x32xf32>
    %30 = tpu.matmul %21, %29, %cst_18 {dimension_numbers = #tpu.dot_dimension_numbers<[1], [0], [0], [1], [0, 0, 1, 1], [], []>} : vector<16x32xbf16>, vector<32x32xbf16>, vector<16x32xf32> -> vector<16x32xf32>
    %c0_19 = arith.constant 0 : index
    %c0_20 = arith.constant 0 : index
    %c0_21 = arith.constant 0 : index
    %c0_22 = arith.constant 0 : index
    %31 = vector.load %arg2[%c0_19, %c0_20, %c0_21, %c0_22] : memref<2x2x1x32xf32, #tpu.memory_space<vmem>>, vector<1x1x1x32xf32>
    %32 = vector.shape_cast %31 : vector<1x1x1x32xf32> to vector<1x32xf32>
    %33 = vector.broadcast %32 : vector<1x32xf32> to vector<16x32xf32>
    %34 = arith.addf %27, %33 : vector<16x32xf32>
    %35 = arith.negf %34 : vector<16x32xf32>
    %36 = math.exp %35 : vector<16x32xf32>
    %cst_23 = arith.constant 1.000000e+00 : f32
    %37 = vector.broadcast %cst_23 : f32 to vector<16x32xf32>
    %38 = arith.addf %37, %36 : vector<16x32xf32>
    %39 = arith.divf %37, %38 : vector<16x32xf32>
    %c0_24 = arith.constant 0 : index
    %c1_25 = arith.constant 1 : index
    %c0_26 = arith.constant 0 : index
    %c0_27 = arith.constant 0 : index
    %40 = vector.load %arg2[%c0_24, %c1_25, %c0_26, %c0_27] : memref<2x2x1x32xf32, #tpu.memory_space<vmem>>, vector<1x1x1x32xf32>
    %41 = vector.shape_cast %40 : vector<1x1x1x32xf32> to vector<1x32xf32>
    %42 = vector.broadcast %41 : vector<1x32xf32> to vector<16x32xf32>
    %43 = arith.addf %30, %42 : vector<16x32xf32>
    %44 = arith.negf %43 : vector<16x32xf32>
    %45 = math.exp %44 : vector<16x32xf32>
    %cst_28 = arith.constant 1.000000e+00 : f32
    %46 = vector.broadcast %cst_28 : f32 to vector<16x32xf32>
    %47 = arith.addf %46, %45 : vector<16x32xf32>
    %48 = arith.divf %46, %47 : vector<16x32xf32>
    %cst_29 = arith.constant 1.000000e+00 : f32
    %49 = vector.broadcast %cst_29 : f32 to vector<16x32xf32>
    %50 = arith.subf %49, %39 : vector<16x32xf32>
    %51 = arith.mulf %50, %24 : vector<16x32xf32>
    %cst_30 = arith.constant 1.000000e+00 : f32
    %52 = vector.broadcast %cst_30 : f32 to vector<16x32xf32>
    %53 = arith.subf %52, %48 : vector<16x32xf32>
    %54 = arith.mulf %53, %20 : vector<16x32xf32>
    %cst_31 = arith.constant dense<0.000000e+00> : vector<16x32xf32>
    %55 = tpu.matmul %7, %51, %cst_31 {dimension_numbers = #tpu.dot_dimension_numbers<[1], [0], [0], [1], [0, 0, 1, 1], [], []>} : vector<16x16xf32>, vector<16x32xf32>, vector<16x32xf32> -> vector<16x32xf32>
    %56 = arith.mulf %39, %55 : vector<16x32xf32>
    %57 = arith.addf %56, %51 : vector<16x32xf32>
    %cst_32 = arith.constant dense<0.000000e+00> : vector<16x32xf32>
    %58 = tpu.matmul %7, %39, %cst_32 {dimension_numbers = #tpu.dot_dimension_numbers<[1], [0], [0], [1], [0, 0, 1, 1], [], []>} : vector<16x16xf32>, vector<16x32xf32>, vector<16x32xf32> -> vector<16x32xf32>
    %59 = arith.mulf %39, %58 : vector<16x32xf32>
    %cst_33 = arith.constant dense<0.000000e+00> : vector<16x32xf32>
    %60 = tpu.matmul %13, %57, %cst_33 {dimension_numbers = #tpu.dot_dimension_numbers<[1], [0], [0], [1], [0, 0, 1, 1], [], []>} : vector<16x16xf32>, vector<16x32xf32>, vector<16x32xf32> -> vector<16x32xf32>
    %61 = arith.mulf %59, %60 : vector<16x32xf32>
    %62 = arith.addf %61, %57 : vector<16x32xf32>
    %cst_34 = arith.constant dense<0.000000e+00> : vector<16x32xf32>
    %63 = tpu.matmul %13, %59, %cst_34 {dimension_numbers = #tpu.dot_dimension_numbers<[1], [0], [0], [1], [0, 0, 1, 1], [], []>} : vector<16x16xf32>, vector<16x32xf32>, vector<16x32xf32> -> vector<16x32xf32>
    %64 = arith.mulf %59, %63 : vector<16x32xf32>
    %cst_35 = arith.constant dense<0.000000e+00> : vector<16x32xf32>
    %65 = tpu.matmul %19, %62, %cst_35 {dimension_numbers = #tpu.dot_dimension_numbers<[1], [0], [0], [1], [0, 0, 1, 1], [], []>} : vector<16x16xf32>, vector<16x32xf32>, vector<16x32xf32> -> vector<16x32xf32>
    %66 = arith.mulf %64, %65 : vector<16x32xf32>
    %67 = arith.addf %66, %62 : vector<16x32xf32>
    %68 = math.tanh %67 : vector<16x32xf32>
    %69 = arith.mulf %48, %68 : vector<16x32xf32>
    %70 = arith.addf %69, %54 : vector<16x32xf32>
    %71 = arith.truncf %70 : vector<16x32xf32> to vector<16x32xbf16>
    %c1_36 = arith.constant 1 : index
    %c0_37 = arith.constant 0 : index
    %c0_38 = arith.constant 0 : index
    %c0_39 = arith.constant 0 : index
    %72 = vector.load %arg1[%c1_36, %c0_37, %c0_38, %c0_39] : memref<2x3x32x32xbf16, #tpu.memory_space<vmem>>, vector<1x1x32x32xbf16>
    %73 = vector.shape_cast %72 : vector<1x1x32x32xbf16> to vector<32x32xbf16>
    %cst_40 = arith.constant dense<0.000000e+00> : vector<16x32xf32>
    %74 = tpu.matmul %71, %73, %cst_40 {dimension_numbers = #tpu.dot_dimension_numbers<[1], [0], [0], [1], [0, 0, 1, 1], [], []>} : vector<16x32xbf16>, vector<32x32xbf16>, vector<16x32xf32> -> vector<16x32xf32>
    %c1_41 = arith.constant 1 : index
    %c1_42 = arith.constant 1 : index
    %c0_43 = arith.constant 0 : index
    %c0_44 = arith.constant 0 : index
    %75 = vector.load %arg1[%c1_41, %c1_42, %c0_43, %c0_44] : memref<2x3x32x32xbf16, #tpu.memory_space<vmem>>, vector<1x1x32x32xbf16>
    %76 = vector.shape_cast %75 : vector<1x1x32x32xbf16> to vector<32x32xbf16>
    %cst_45 = arith.constant dense<0.000000e+00> : vector<16x32xf32>
    %77 = tpu.matmul %71, %76, %cst_45 {dimension_numbers = #tpu.dot_dimension_numbers<[1], [0], [0], [1], [0, 0, 1, 1], [], []>} : vector<16x32xbf16>, vector<32x32xbf16>, vector<16x32xf32> -> vector<16x32xf32>
    %c1_46 = arith.constant 1 : index
    %c2_47 = arith.constant 2 : index
    %c0_48 = arith.constant 0 : index
    %c0_49 = arith.constant 0 : index
    %78 = vector.load %arg1[%c1_46, %c2_47, %c0_48, %c0_49] : memref<2x3x32x32xbf16, #tpu.memory_space<vmem>>, vector<1x1x32x32xbf16>
    %79 = vector.shape_cast %78 : vector<1x1x32x32xbf16> to vector<32x32xbf16>
    %cst_50 = arith.constant dense<0.000000e+00> : vector<16x32xf32>
    %80 = tpu.matmul %71, %79, %cst_50 {dimension_numbers = #tpu.dot_dimension_numbers<[1], [0], [0], [1], [0, 0, 1, 1], [], []>} : vector<16x32xbf16>, vector<32x32xbf16>, vector<16x32xf32> -> vector<16x32xf32>
    %c1_51 = arith.constant 1 : index
    %c0_52 = arith.constant 0 : index
    %c0_53 = arith.constant 0 : index
    %c0_54 = arith.constant 0 : index
    %81 = vector.load %arg2[%c1_51, %c0_52, %c0_53, %c0_54] : memref<2x2x1x32xf32, #tpu.memory_space<vmem>>, vector<1x1x1x32xf32>
    %82 = vector.shape_cast %81 : vector<1x1x1x32xf32> to vector<1x32xf32>
    %83 = vector.broadcast %82 : vector<1x32xf32> to vector<16x32xf32>
    %84 = arith.addf %77, %83 : vector<16x32xf32>
    %85 = arith.negf %84 : vector<16x32xf32>
    %86 = math.exp %85 : vector<16x32xf32>
    %cst_55 = arith.constant 1.000000e+00 : f32
    %87 = vector.broadcast %cst_55 : f32 to vector<16x32xf32>
    %88 = arith.addf %87, %86 : vector<16x32xf32>
    %89 = arith.divf %87, %88 : vector<16x32xf32>
    %c1_56 = arith.constant 1 : index
    %c1_57 = arith.constant 1 : index
    %c0_58 = arith.constant 0 : index
    %c0_59 = arith.constant 0 : index
    %90 = vector.load %arg2[%c1_56, %c1_57, %c0_58, %c0_59] : memref<2x2x1x32xf32, #tpu.memory_space<vmem>>, vector<1x1x1x32xf32>
    %91 = vector.shape_cast %90 : vector<1x1x1x32xf32> to vector<1x32xf32>
    %92 = vector.broadcast %91 : vector<1x32xf32> to vector<16x32xf32>
    %93 = arith.addf %80, %92 : vector<16x32xf32>
    %94 = arith.negf %93 : vector<16x32xf32>
    %95 = math.exp %94 : vector<16x32xf32>
    %cst_60 = arith.constant 1.000000e+00 : f32
    %96 = vector.broadcast %cst_60 : f32 to vector<16x32xf32>
    %97 = arith.addf %96, %95 : vector<16x32xf32>
    %98 = arith.divf %96, %97 : vector<16x32xf32>
    %cst_61 = arith.constant 1.000000e+00 : f32
    %99 = vector.broadcast %cst_61 : f32 to vector<16x32xf32>
    %100 = arith.subf %99, %89 : vector<16x32xf32>
    %101 = arith.mulf %100, %74 : vector<16x32xf32>
    %cst_62 = arith.constant 1.000000e+00 : f32
    %102 = vector.broadcast %cst_62 : f32 to vector<16x32xf32>
    %103 = arith.subf %102, %98 : vector<16x32xf32>
    %104 = arith.mulf %103, %70 : vector<16x32xf32>
    %cst_63 = arith.constant dense<0.000000e+00> : vector<16x32xf32>
    %105 = tpu.matmul %7, %101, %cst_63 {dimension_numbers = #tpu.dot_dimension_numbers<[1], [0], [0], [1], [0, 0, 1, 1], [], []>} : vector<16x16xf32>, vector<16x32xf32>, vector<16x32xf32> -> vector<16x32xf32>
    %106 = arith.mulf %89, %105 : vector<16x32xf32>
    %107 = arith.addf %106, %101 : vector<16x32xf32>
    %cst_64 = arith.constant dense<0.000000e+00> : vector<16x32xf32>
    %108 = tpu.matmul %7, %89, %cst_64 {dimension_numbers = #tpu.dot_dimension_numbers<[1], [0], [0], [1], [0, 0, 1, 1], [], []>} : vector<16x16xf32>, vector<16x32xf32>, vector<16x32xf32> -> vector<16x32xf32>
    %109 = arith.mulf %89, %108 : vector<16x32xf32>
    %cst_65 = arith.constant dense<0.000000e+00> : vector<16x32xf32>
    %110 = tpu.matmul %13, %107, %cst_65 {dimension_numbers = #tpu.dot_dimension_numbers<[1], [0], [0], [1], [0, 0, 1, 1], [], []>} : vector<16x16xf32>, vector<16x32xf32>, vector<16x32xf32> -> vector<16x32xf32>
    %111 = arith.mulf %109, %110 : vector<16x32xf32>
    %112 = arith.addf %111, %107 : vector<16x32xf32>
    %cst_66 = arith.constant dense<0.000000e+00> : vector<16x32xf32>
    %113 = tpu.matmul %13, %109, %cst_66 {dimension_numbers = #tpu.dot_dimension_numbers<[1], [0], [0], [1], [0, 0, 1, 1], [], []>} : vector<16x16xf32>, vector<16x32xf32>, vector<16x32xf32> -> vector<16x32xf32>
    %114 = arith.mulf %109, %113 : vector<16x32xf32>
    %cst_67 = arith.constant dense<0.000000e+00> : vector<16x32xf32>
    %115 = tpu.matmul %19, %112, %cst_67 {dimension_numbers = #tpu.dot_dimension_numbers<[1], [0], [0], [1], [0, 0, 1, 1], [], []>} : vector<16x16xf32>, vector<16x32xf32>, vector<16x32xf32> -> vector<16x32xf32>
    %116 = arith.mulf %114, %115 : vector<16x32xf32>
    %117 = arith.addf %116, %112 : vector<16x32xf32>
    %118 = math.tanh %117 : vector<16x32xf32>
    %119 = arith.mulf %98, %118 : vector<16x32xf32>
    %120 = arith.addf %119, %104 : vector<16x32xf32>
    %121 = tpu.iota {dimensions = array<i32: 0>} : vector<4x16xi32>
    %122 = tpu.iota {dimensions = array<i32: 1>} : vector<4x16xi32>
    %123 = tpu.iota {dimensions = array<i32: 0>} : vector<32x128xi32>
    %124 = tpu.iota {dimensions = array<i32: 1>} : vector<32x128xi32>
    %cst_68 = arith.constant 0.000000e+00 : f32
    %125 = vector.broadcast %cst_68 : f32 to vector<4x128xf32>
    %c0_i32 = arith.constant 0 : i32
    %126 = vector.broadcast %c0_i32 : i32 to vector<4x16xi32>
    %127 = arith.addi %121, %126 : vector<4x16xi32>
    %128 = arith.cmpi eq, %122, %127 : vector<4x16xi32>
    %cst_69 = arith.constant 1.000000e+00 : f32
    %cst_70 = arith.constant 0.000000e+00 : f32
    %129 = vector.broadcast %cst_69 : f32 to vector<4x16xf32>
    %130 = vector.broadcast %cst_70 : f32 to vector<4x16xf32>
    %131 = arith.select %128, %129, %130 : vector<4x16xi1>, vector<4x16xf32>
    %c0_i32_71 = arith.constant 0 : i32
    %132 = vector.broadcast %c0_i32_71 : i32 to vector<32x128xi32>
    %133 = arith.addi %123, %132 : vector<32x128xi32>
    %134 = arith.cmpi eq, %124, %133 : vector<32x128xi32>
    %cst_72 = arith.constant 1.000000e+00 : f32
    %cst_73 = arith.constant 0.000000e+00 : f32
    %135 = vector.broadcast %cst_72 : f32 to vector<32x128xf32>
    %136 = vector.broadcast %cst_73 : f32 to vector<32x128xf32>
    %137 = arith.select %134, %135, %136 : vector<32x128xi1>, vector<32x128xf32>
    %cst_74 = arith.constant dense<0.000000e+00> : vector<4x32xf32>
    %138 = tpu.matmul %131, %120, %cst_74 {dimension_numbers = #tpu.dot_dimension_numbers<[1], [0], [0], [1], [0, 0, 1, 1], [], []>} : vector<4x16xf32>, vector<16x32xf32>, vector<4x32xf32> -> vector<4x32xf32>
    %cst_75 = arith.constant dense<0.000000e+00> : vector<4x128xf32>
    %139 = tpu.matmul %138, %137, %cst_75 {dimension_numbers = #tpu.dot_dimension_numbers<[1], [0], [0], [1], [0, 0, 1, 1], [], []>} : vector<4x32xf32>, vector<32x128xf32>, vector<4x128xf32> -> vector<4x128xf32>
    %140 = arith.addf %125, %139 : vector<4x128xf32>
    %c4_i32_76 = arith.constant 4 : i32
    %141 = vector.broadcast %c4_i32_76 : i32 to vector<4x16xi32>
    %142 = arith.addi %121, %141 : vector<4x16xi32>
    %143 = arith.cmpi eq, %122, %142 : vector<4x16xi32>
    %cst_77 = arith.constant 1.000000e+00 : f32
    %cst_78 = arith.constant 0.000000e+00 : f32
    %144 = vector.broadcast %cst_77 : f32 to vector<4x16xf32>
    %145 = vector.broadcast %cst_78 : f32 to vector<4x16xf32>
    %146 = arith.select %143, %144, %145 : vector<4x16xi1>, vector<4x16xf32>
    %c32_i32 = arith.constant 32 : i32
    %147 = vector.broadcast %c32_i32 : i32 to vector<32x128xi32>
    %148 = arith.addi %123, %147 : vector<32x128xi32>
    %149 = arith.cmpi eq, %124, %148 : vector<32x128xi32>
    %cst_79 = arith.constant 1.000000e+00 : f32
    %cst_80 = arith.constant 0.000000e+00 : f32
    %150 = vector.broadcast %cst_79 : f32 to vector<32x128xf32>
    %151 = vector.broadcast %cst_80 : f32 to vector<32x128xf32>
    %152 = arith.select %149, %150, %151 : vector<32x128xi1>, vector<32x128xf32>
    %cst_81 = arith.constant dense<0.000000e+00> : vector<4x32xf32>
    %153 = tpu.matmul %146, %120, %cst_81 {dimension_numbers = #tpu.dot_dimension_numbers<[1], [0], [0], [1], [0, 0, 1, 1], [], []>} : vector<4x16xf32>, vector<16x32xf32>, vector<4x32xf32> -> vector<4x32xf32>
    %cst_82 = arith.constant dense<0.000000e+00> : vector<4x128xf32>
    %154 = tpu.matmul %153, %152, %cst_82 {dimension_numbers = #tpu.dot_dimension_numbers<[1], [0], [0], [1], [0, 0, 1, 1], [], []>} : vector<4x32xf32>, vector<32x128xf32>, vector<4x128xf32> -> vector<4x128xf32>
    %155 = arith.addf %140, %154 : vector<4x128xf32>
    %c8_i32_83 = arith.constant 8 : i32
    %156 = vector.broadcast %c8_i32_83 : i32 to vector<4x16xi32>
    %157 = arith.addi %121, %156 : vector<4x16xi32>
    %158 = arith.cmpi eq, %122, %157 : vector<4x16xi32>
    %cst_84 = arith.constant 1.000000e+00 : f32
    %cst_85 = arith.constant 0.000000e+00 : f32
    %159 = vector.broadcast %cst_84 : f32 to vector<4x16xf32>
    %160 = vector.broadcast %cst_85 : f32 to vector<4x16xf32>
    %161 = arith.select %158, %159, %160 : vector<4x16xi1>, vector<4x16xf32>
    %c64_i32 = arith.constant 64 : i32
    %162 = vector.broadcast %c64_i32 : i32 to vector<32x128xi32>
    %163 = arith.addi %123, %162 : vector<32x128xi32>
    %164 = arith.cmpi eq, %124, %163 : vector<32x128xi32>
    %cst_86 = arith.constant 1.000000e+00 : f32
    %cst_87 = arith.constant 0.000000e+00 : f32
    %165 = vector.broadcast %cst_86 : f32 to vector<32x128xf32>
    %166 = vector.broadcast %cst_87 : f32 to vector<32x128xf32>
    %167 = arith.select %164, %165, %166 : vector<32x128xi1>, vector<32x128xf32>
    %cst_88 = arith.constant dense<0.000000e+00> : vector<4x32xf32>
    %168 = tpu.matmul %161, %120, %cst_88 {dimension_numbers = #tpu.dot_dimension_numbers<[1], [0], [0], [1], [0, 0, 1, 1], [], []>} : vector<4x16xf32>, vector<16x32xf32>, vector<4x32xf32> -> vector<4x32xf32>
    %cst_89 = arith.constant dense<0.000000e+00> : vector<4x128xf32>
    %169 = tpu.matmul %168, %167, %cst_89 {dimension_numbers = #tpu.dot_dimension_numbers<[1], [0], [0], [1], [0, 0, 1, 1], [], []>} : vector<4x32xf32>, vector<32x128xf32>, vector<4x128xf32> -> vector<4x128xf32>
    %170 = arith.addf %155, %169 : vector<4x128xf32>
    %c12_i32 = arith.constant 12 : i32
    %171 = vector.broadcast %c12_i32 : i32 to vector<4x16xi32>
    %172 = arith.addi %121, %171 : vector<4x16xi32>
    %173 = arith.cmpi eq, %122, %172 : vector<4x16xi32>
    %cst_90 = arith.constant 1.000000e+00 : f32
    %cst_91 = arith.constant 0.000000e+00 : f32
    %174 = vector.broadcast %cst_90 : f32 to vector<4x16xf32>
    %175 = vector.broadcast %cst_91 : f32 to vector<4x16xf32>
    %176 = arith.select %173, %174, %175 : vector<4x16xi1>, vector<4x16xf32>
    %c96_i32 = arith.constant 96 : i32
    %177 = vector.broadcast %c96_i32 : i32 to vector<32x128xi32>
    %178 = arith.addi %123, %177 : vector<32x128xi32>
    %179 = arith.cmpi eq, %124, %178 : vector<32x128xi32>
    %cst_92 = arith.constant 1.000000e+00 : f32
    %cst_93 = arith.constant 0.000000e+00 : f32
    %180 = vector.broadcast %cst_92 : f32 to vector<32x128xf32>
    %181 = vector.broadcast %cst_93 : f32 to vector<32x128xf32>
    %182 = arith.select %179, %180, %181 : vector<32x128xi1>, vector<32x128xf32>
    %cst_94 = arith.constant dense<0.000000e+00> : vector<4x32xf32>
    %183 = tpu.matmul %176, %120, %cst_94 {dimension_numbers = #tpu.dot_dimension_numbers<[1], [0], [0], [1], [0, 0, 1, 1], [], []>} : vector<4x16xf32>, vector<16x32xf32>, vector<4x32xf32> -> vector<4x32xf32>
    %cst_95 = arith.constant dense<0.000000e+00> : vector<4x128xf32>
    %184 = tpu.matmul %183, %182, %cst_95 {dimension_numbers = #tpu.dot_dimension_numbers<[1], [0], [0], [1], [0, 0, 1, 1], [], []>} : vector<4x32xf32>, vector<32x128xf32>, vector<4x128xf32> -> vector<4x128xf32>
    %185 = arith.addf %170, %184 : vector<4x128xf32>
    %c0_96 = arith.constant 0 : index
    %c0_97 = arith.constant 0 : index
    %186 = vector.load %arg3[%c0_96, %c0_97] : memref<4x128xf32, #tpu.memory_space<vmem>>, vector<4x128xf32>
    tpu.vector_store %arg3[%c0_96, %c0_97], %185 {strides = array<i32>} : memref<4x128xf32, #tpu.memory_space<vmem>>, vector<4x128xf32>,
    return
  }
}

</mosaic_0001>

<bundles_post_ra>
// kernel: sru_forward.1
= control target key start
LH: loop header
LB: loop body
LE: loop exit
PB: predicated region body
PF: predicated region fallthrough
CT: control target
= control target key end

     0   :  { %8 = vsyncpa [#allocation3], 0  ;;  %s2803_s0 = inlined_call_operand.hbm [shape: f32[16,32], index: 0, kind: input, shape index: {}]   ;;  %s2804_s1 = inlined_call_operand.hbm [shape: bf16[2,3,32,32], index: 1, kind: input, shape index: {}]   ;;  %s2805_s2 = inlined_call_operand.vmem [shape: f32[2,2,1,32], index: 2, kind: input, shape index: {}]   ;;  %s2806_s3 = inlined_call_operand.vmem [shape: f32[4,128], index: 3, kind: output, shape index: {}]  }
   0x1   :  { %9 = vsyncpa [#allocation5], 0  ;;  %s2523_s12 = smov [#allocation2]   ;;  %s2475_s16 = scalar_lea.hbm %s2803_s0, 256 }
   0x2   :  { %s15_s13 = sshll.u32 %s2523_s12, 4  ;;  %p2476_p0 = scmp.ne.s32.totalorder %s2803_s0, %s2475_s16  ;;  %s16_s13 = int_to_ptr.vmem [resolvable:$true] %s15_s13 }
   0x3   :  { %p2479_p1 = scmp.lt.u32.totalorder %s2475_s16, %s2803_s0 }
   0x5   :  { %p2481_p2 = pnand %p2479_p1, %p2476_p0 }
   0x7   :  { %2484 = shalt.err (!%p2481_p2)
}
   0x8   :  { %s2485_s21 = scalar_lea.vmem %s16_s13, 256  ;;  %p2490_p4 = scmp.lt.s32.totalorder %s16_s13, %s16_s13 }
   0x9   :  { %p2486_p3 = scmp.ne.s32.totalorder %s16_s13, %s2485_s21  ;;  %p2491_p5 = scmp.lt.s32.totalorder %s2485_s21, %s2485_s21 }
   0xb   :  { %p2492_p6 = por %p2491_p5, %p2490_p4 }
   0xd   :  { %p2493_p7 = pnand %p2492_p6, %p2486_p3 }
   0xf   :  { %2496 = shalt.err (!%p2493_p7)
}
  0x10   :  { %s2524_s22 = smov 128   ;;  %s2525_s23 = smov 8  }
  0x11   :  { %21 = dma.hbm_to_vmem [thread:$0]  %s2803_s0, 256, %s16_s13, [#allocation3], %s2524_s22, %s2524_s22, %s2525_s23  }
  0x12   :  { %s2526_s26 = smov [#allocation4]   ;;  %s2497_s30 = scalar_lea.hbm %s2804_s1, 1536 }
  0x13   :  { %s27_s27 = sshll.u32 %s2526_s26, 4  ;;  %p2498_p8 = scmp.ne.s32.totalorder %s2804_s1, %s2497_s30  ;;  %s28_s27 = int_to_ptr.vmem [resolvable:$true] %s27_s27 }
  0x14   :  { %p2501_p9 = scmp.lt.u32.totalorder %s2497_s30, %s2804_s1 }
  0x16   :  { %p2503_p10 = pnand %p2501_p9, %p2498_p8 }
  0x18   :  { %2506 = shalt.err (!%p2503_p10)
}
  0x19   :  { %s2507_s8 = scalar_lea.vmem %s28_s27, 1536  ;;  %p2512_p12 = scmp.lt.s32.totalorder %s28_s27, %s28_s27 }
  0x1a   :  { %p2508_p11 = scmp.ne.s32.totalorder %s28_s27, %s2507_s8  ;;  %p2513_p13 = scmp.lt.s32.totalorder %s2507_s8, %s2507_s8 }
  0x1c   :  { %p2514_p0 = por %p2513_p13, %p2512_p12 }
  0x1e   :  { %p2515_p1 = pnand %p2514_p0, %p2508_p11 }
  0x20   :  { %2518 = shalt.err (!%p2515_p1)
}
  0x21   :  { %s2527_s0 = smov 64   ;;  %s2528_s9 = smov 4  }
  0x22   :  { %33 = dma.hbm_to_vmem [thread:$0]  %s2804_s1, 1536, %s28_s27, [#allocation5], %s2527_s0, %s2527_s0, %s2528_s9  }
  0x23   :  { %2519 = dma.done.wait [#allocation3], 256  }
  0x24   :  { %2520 = vsyncadd [#allocation3], 4294967040 }
  0x25   :  { %2521 = dma.done.wait [#allocation5], 1536  }
  0x26   :  { %2522 = vsyncadd [#allocation5], 4294965760  ;;  %v2529_v0 = vmov 0.0   ;;  %vm2530_vm0 = vmmov 0   ;;  %v2423_v1 = vld [vmem:[#allocation4 + $0x10] sm:$0xff]   ;;  %v2424_v2 = vld [vmem:[#allocation4 + $0x18] sm:$0xff]   ;;  %v43_v8 = vlaneseq }
  0x27   :  { %2149 = vmatprep.subr.bf16.mxu1 %v2529_v0  ;;  %2153 = vmatprep.mubr.msk.bf16.mxu1 %vm2530_vm0, %v2529_v0  ;;  %v2583_v3 = vld [vmem:[#allocation2] sm:$0xff]  ;;  %v2585_v4 = vld [vmem:[#allocation2 + $0x8] sm:$0xff]  ;;  %v2425_v5 = vld [vmem:[#allocation4] sm:$0xff]   ;;  %vm84_vm1 = vcmask 261120   ;;  %vm292_vm3 = vcmask 130048  }
  0x28   :  { %2141 = vmatprep.subr.bf16.mxu0 %v2529_v0  ;;  %2145 = vmatprep.mubr.msk.bf16.mxu0 %vm2530_vm0, %v2529_v0  ;;  %v2426_v6 = vld [vmem:[#allocation4 + $0x8] sm:$0xff]   ;;  %v67_v7 = vpack.c.bf16 %v2585_v4, %v2583_v3  ;;  %v2596_v9 = vshrl.u32 %v43_v8, 7  ;;  %v2598_v10 = vand.u32 127, %v43_v8  ;;  %v2427_v13 = vld [vmem:[#allocation4 + $0x20] sm:$0xff]   ;;  %v1979_v15 = vld [vmem:[%s2805_s2] ss:$0 sm:$0xff] }
  0x29   :  { %2150 = vmatpush3.bf16.msra.mxu1 %v2423_v1  ;;  %2142 = vmatpush3.bf16.msra.mxu0 %v2425_v5  ;;  %v2428_v14 = vld [vmem:[#allocation4 + $0x28] sm:$0xff]  }
  0x2a   :  { %2151 = vmatprep.subr.bf16.mxu1 %v2529_v0  ;;  %2143 = vmatprep.subr.bf16.mxu0 %v2529_v0  ;;  %v1971_v11 = vadd.s32 4294967294, %v2596_v9  ;;  %v2613_v32 = vadd.s32 8, %v2596_v9  ;;  %v1973_v43 = vadd.s32 4294967292, %v2596_v9  ;;  %vm62_vm7 = vcmp.eq.s32.totalorder %v2598_v10, %v2596_v9 }
  0x2c   :  { %vm50_vm2 = vcmp.eq.s32.totalorder %v2598_v10, %v1971_v11  ;;  %v1972_v37 = vadd.s32 4294967294, %v2613_v32  ;;  %vm56_vm5 = vcmp.eq.s32.totalorder %v2598_v10, %v1973_v43  ;;  %v1974_v53 = vadd.s32 4294967292, %v2613_v32 }
  0x2d   :  { %2152 = vmatpush3.bf16.msra.mxu1 %v2424_v2  ;;  %2144 = vmatpush3.bf16.msra.mxu0 %v2426_v6  ;;  %v2603_v12 = vsel %vm50_vm2, 1.0, %v2529_v0  ;;  %v2629_v44 = vsel %vm56_vm5, 1.0, %v2529_v0  ;;  %vm1333_vm11 = vcmp.eq.s32.totalorder %v2598_v10, %v2613_v32 }
  0x2e   :  { %2157 = vmatprep.subr.bf16.mxu0 %v2529_v0  ;;  %vm51_vm4 = vcmp.eq.s32.totalorder %v2598_v10, %v1972_v37  ;;  %vm57_vm6 = vcmp.eq.s32.totalorder %v2598_v10, %v1974_v53 }
  0x2f   :  { %v2618_v42 = vsel %vm51_vm4, 1.0, %v2529_v0  ;;  %v2638_v62 = vsel %vm57_vm6, 1.0, %v2529_v0  ;;  %vm2384_vm4 = vmpackc.low %vm1333_vm11, %vm62_vm7 }
  0x30   :  { %2154 = vmatmul.mubr.msk.bf16.vlgmr.msra.gmra.mrb[0].mxu1 %vm84_vm1, %v67_v7  ;;  %2146 = vmatmul.mubr.msk.bf16.vlgmr.msra.gmra.mrb[0].mxu0 %vm84_vm1, %v67_v7 }
  0x31   :  { %2161 = vmatprep.mubr.msk.bf16.mxu0 %vm2530_vm0, %v2529_v0  ;;  %2169 = vmatprep.mubr.msk.f32.mxu1 %vm292_vm3, %v2603_v12 }
  0x32   :  { %2158 = vmatpush3.bf16.msra.mxu0 %v2427_v13 }
  0x33   :  { %2159 = vmatprep.subr.bf16.mxu0 %v2529_v0 }
  0x36   :  { %2160 = vmatpush3.bf16.msra.mxu0 %v2428_v14  ;;  %v2654_v14 = vsel %vm62_vm7, 1.0, %v2529_v0 }
  0x39   :  { %2162 = vmatmul.mubr.msk.bf16.vlgmr.msra.gmra.mrb[4].mxu0 %vm84_vm1, %v67_v7 }
  0x3a   :  { %2183 = vmatprep.mubr.msk.f32.mxu0 %vm292_vm3, %v2629_v44 }
 0x103   :  { %v192_v16 = vpop.f32.mrb[0].mxu1  ;;  %v122_v23 = vpop.f32.mrb[0].mxu0 }
 0x104   :  { %v193_v17 = vadd.f32 %v1979_v15, %v192_v16  ;;  %v2155_v18 = vpop.f32.mrb[1].mxu1  ;;  %v2147_v24 = vpop.f32.mrb[1].mxu0  ;;  %v2430_v16 = vld [vmem:[#allocation4 + $0x38] sm:$0xff]  }
 0x105   :  { %v195_v19 = vpop.f32.mrb[2].mxu1  ;;  %v125_v26 = vpop.f32.mrb[2].mxu0 }
 0x106   :  { %v1983_v20 = vmul.f32 -1.442695, %v193_v17  ;;  %v196_v21 = vadd.f32 %v1979_v15, %v195_v19  ;;  %v2156_v22 = vpop.f32.mrb[3].mxu1  ;;  %v2148_v27 = vpop.f32.mrb[3].mxu0  ;;  %v2429_v15 = vld [vmem:[#allocation4 + $0x30] sm:$0xff]  }
 0x107   :  { %v1986_v17 = vld [vmem:[%s2805_s2 + $0x1] ss:$0 sm:$0xff] }
 0x108   :  { %2435 = vpow2.f32 %v1983_v20  ;;  %v1984_v25 = vmul.f32 -1.442695, %v196_v21 }
 0x10a   :  { %2437 = vpow2.f32 %v1984_v25 }
 0x10c   :  { %v265_v45 = vpop.f32.mrb[4].mxu0 }
 0x10d   :  { %v2163_v46 = vpop.f32.mrb[5].mxu0  ;;  %v266_v19 = vadd.f32 %v1986_v17, %v265_v45 }
 0x10e   :  { %v268_v47 = vpop.f32.mrb[6].mxu0 }
 0x10f   :  { %v2164_v48 = vpop.f32.mrb[7].mxu0  ;;  %v269_v18 = vadd.f32 %v1986_v17, %v268_v47  ;;  %v1990_v21 = vmul.f32 -1.442695, %v266_v19 }
 0x111   :  { %v1991_v20 = vmul.f32 -1.442695, %v269_v18 }
 0x112   :  { %v2436_v28 = vpop.eup %2435 }
 0x113   :  { %v205_v29 = vadd.f32 1.0, %v2436_v28 }
 0x114   :  { %v2438_v30 = vpop.eup %2437 }
 0x115   :  { %2439 = vrcp.f32 %v205_v29  ;;  %v206_v31 = vadd.f32 1.0, %v2438_v30 }
 0x117   :  { %2441 = vrcp.f32 %v206_v31 }
 0x118   :  { %2443 = vpow2.f32 %v1991_v20 }
 0x119   :  { %2445 = vpow2.f32 %v1990_v21 }
 0x11f   :  { %v2440_v33 = vpop.eup %2439 }
 0x120   :  { %v284_v34 = vsub.f32 1.0, %v2440_v33 }
 0x121   :  { %v2442_v35 = vpop.eup %2441 }
 0x122   :  { %v285_v36 = vsub.f32 1.0, %v2442_v35  ;;  %v286_v38 = vmul.f32 %v284_v34, %v122_v23  ;;  %v2335_v41 = vpack.c.bf16 %v2442_v35, %v2440_v33  ;;  %v2444_v22 = vpop.eup %2443 }
 0x123   :  { %v2446_v23 = vpop.eup %2445  ;;  %v279_v24 = vadd.f32 1.0, %v2444_v22 }
 0x124   :  { %v287_v39 = vmul.f32 %v285_v36, %v125_v26  ;;  %v278_v25 = vadd.f32 1.0, %v2446_v23 }
 0x125   :  { %2447 = vrcp.f32 %v279_v24 }
 0x126   :  { %v2331_v40 = vpack.c.bf16 %v287_v39, %v286_v38  ;;  %2449 = vrcp.f32 %v278_v25 }
 0x128   :  { %2332 = vmatprep.subr.bf16.mxu1 %v2331_v40 }
 0x129   :  { %2334 = vmatpush3.bf16.msra.mxu1 %v2331_v40 }
 0x12a   :  { %2336 = vmatprep.subr.bf16.mxu1 %v2335_v41 }
 0x12c   :  { %2170 = vmatmul.mubr.msk.f32.vlgmr.msra.gmra.mrb[4].mxu1 %vm292_vm3, %v2618_v42 }
 0x12d   :  { %2338 = vmatpush3.bf16.msra.mxu1 %v2335_v41  ;;  %2176 = vmatprep.mubr.msk.f32.mxu1 %vm292_vm3, %v2603_v12 }
 0x130   :  { %2177 = vmatmul.mubr.msk.f32.vlgmr.msra.gmra.mrb[6].mxu1 %vm292_vm3, %v2618_v42 }
 0x131   :  { %2190 = vmatprep.mubr.msk.f32.mxu1 %vm292_vm3, %v2629_v44 }
 0x1ff   :  { %v2171_v49 = vpop.f32.mrb[4].mxu1 }
 0x200   :  { %v375_v50 = vmul.f32 %v2442_v35, %v2171_v49  ;;  %v365_v51 = vpop.f32.mrb[5].mxu1  ;;  %v2431_v49 = vld [vmem:[#allocation4 + $0x40] sm:$0xff]  }
 0x201   :  { %v374_v52 = vmul.f32 %v2440_v33, %v365_v51  ;;  %v2432_v51 = vld [vmem:[#allocation4 + $0x48] sm:$0xff]  }
 0x202   :  { %v377_v54 = vadd.f32 %v375_v50, %v287_v39 }
 0x203   :  { %v376_v55 = vadd.f32 %v374_v52, %v286_v38  ;;  %v2178_v56 = vpop.f32.mrb[6].mxu1 }
 0x204   :  { %v454_v57 = vmul.f32 %v2442_v35, %v2178_v56  ;;  %v444_v58 = vpop.f32.mrb[7].mxu1  ;;  %v2448_v35 = vpop.eup %2447  ;;  %v2005_v56 = vld [vmem:[%s2805_s2 + $0x2] ss:$0 sm:$0xff] }
 0x205   :  { %v453_v59 = vmul.f32 %v2440_v33, %v444_v58  ;;  %v2339_v60 = vpack.c.bf16 %v377_v54, %v376_v55  ;;  %v2450_v36 = vpop.eup %2449  ;;  %v289_v37 = vsub.f32 1.0, %v2448_v35 }
 0x206   :  { %v288_v38 = vsub.f32 1.0, %v2450_v36 }
 0x207   :  { %2340 = vmatprep.subr.bf16.mxu0 %v2339_v60  ;;  %v2343_v61 = vpack.c.bf16 %v454_v57, %v453_v59  ;;  %v291_v43 = vmul.f32 %v289_v37, %v2585_v4  ;;  %v2433_v4 = vld [vmem:[#allocation4 + $0x50] sm:$0xff]  }
 0x208   :  { %2342 = vmatpush3.bf16.msra.mxu0 %v2339_v60  ;;  %v290_v46 = vmul.f32 %v288_v38, %v2583_v3  ;;  %v2434_v3 = vld [vmem:[#allocation4 + $0x58] sm:$0xff]  }
 0x209   :  { %2344 = vmatprep.subr.bf16.mxu1 %v2343_v61 }
 0x20a   :  { %2346 = vmatpush3.bf16.msra.mxu1 %v2343_v61 }
 0x20b   :  { %2184 = vmatmul.mubr.msk.f32.vlgmr.msra.gmra.mrb[8].mxu0 %vm292_vm3, %v2638_v62  ;;  %2200 = vmatprep.subr.bf16.mxu1 %v2529_v0 }
 0x20c   :  { %2197 = vmatprep.mubr.f32.mxu0 %v2529_v0 }
 0x20d   :  { %2191 = vmatmul.mubr.msk.f32.vlgmr.msra.gmra.mrb[8].mxu1 %vm292_vm3, %v2638_v62 }
 0x20e   :  { %2204 = vmatprep.mubr.msk.bf16.mxu1 %vm2530_vm0, %v2529_v0  ;;  %2201 = vmatpush3.bf16.msra.mxu1 %v2429_v15 }
 0x20f   :  { %2202 = vmatprep.subr.bf16.mxu1 %v2529_v0 }
 0x212   :  { %2203 = vmatpush3.bf16.msra.mxu1 %v2430_v16 }
 0x213   :  { %2208 = vmatprep.subr.bf16.mxu1 %v2529_v0 }
 0x2de   :  { %v2185_v63 = vpop.f32.mrb[8].mxu0 }
 0x2df   :  { %v537_v1 = vmul.f32 %v2185_v63, %v454_v57  ;;  %v527_v2 = vpop.f32.mrb[9].mxu0 }
 0x2e0   :  { %v536_v5 = vmul.f32 %v527_v2, %v453_v59  ;;  %v2192_v6 = vpop.f32.mrb[8].mxu1 }
 0x2e1   :  { %v539_v7 = vadd.f32 %v537_v1, %v377_v54  ;;  %v606_v8 = vpop.f32.mrb[9].mxu1  ;;  %v616_v26 = vmul.f32 %v2192_v6, %v454_v57 }
 0x2e2   :  { %v538_v11 = vadd.f32 %v536_v5, %v376_v55  ;;  %v615_v27 = vmul.f32 %v606_v8, %v453_v59 }
 0x2e4   :  { %v2347_v13 = vpack.c.bf16 %v539_v7, %v538_v11 }
 0x2e6   :  { %2348 = vmatprep.subr.bf16.mxu0 %v2347_v13 }
 0x2e7   :  { %2350 = vmatpush3.bf16.msra.mxu0 %v2347_v13 }
 0x2ea   :  { %2198 = vmatmul.mubr.msk.f32.vlgmr.msra.gmra.mrb[10].mxu0 %vm292_vm3, %v2654_v14 }
 0x2eb   :  { %2228 = vmatprep.mubr.msk.f32.mxu0 %vm292_vm3, %v2603_v12 }
 0x3bd   :  { %v2199_v28 = vpop.f32.mrb[10].mxu0 }
 0x3be   :  { %v699_v29 = vmul.f32 %v2199_v28, %v616_v26  ;;  %v689_v30 = vpop.f32.mrb[11].mxu0 }
 0x3bf   :  { %v698_v31 = vmul.f32 %v689_v30, %v615_v27 }
 0x3c0   :  { %v701_v33 = vadd.f32 %v699_v29, %v539_v7 }
 0x3c1   :  { %v700_v34 = vadd.f32 %v698_v31, %v538_v11 }
 0x3c2   :  { %2451 = vtanh.f32 %v701_v33 }
 0x3c3   :  { %2453 = vtanh.f32 %v700_v34 }
 0x3cc   :  { %v2452_v39 = vpop.eup %2451 }
 0x3cd   :  { %v2454_v40 = vpop.eup %2453  ;;  %v705_v41 = vmul.f32 %v2452_v39, %v2448_v35 }
 0x3ce   :  { %v704_v45 = vmul.f32 %v2454_v40, %v2450_v36 }
 0x3cf   :  { %v2667_v47 = vadd.f32 %v705_v41, %v291_v43 }
 0x3d0   :  { %v2669_v48 = vadd.f32 %v704_v45, %v290_v46  ;;  %v2012_v46 = vld [vmem:[%s2805_s2 + $0x3] ss:$0 sm:$0xff] }
 0x3d2   :  { %v708_v50 = vpack.c.bf16 %v2667_v47, %v2669_v48 }
 0x3d4   :  { %2205 = vmatmul.mubr.msk.bf16.vlgmr.msra.gmra.mrb[12].mxu1 %vm84_vm1, %v708_v50 }
 0x3d5   :  { %2209 = vmatpush3.bf16.msra.mxu1 %v2431_v49  ;;  %2212 = vmatprep.mubr.msk.bf16.mxu1 %vm2530_vm0, %v2529_v0 }
 0x3d6   :  { %2210 = vmatprep.subr.bf16.mxu1 %v2529_v0 }
 0x3d9   :  { %2211 = vmatpush3.bf16.msra.mxu1 %v2432_v51 }
 0x3da   :  { %2216 = vmatprep.subr.bf16.mxu1 %v2529_v0 }
 0x3dc   :  { %2213 = vmatmul.mubr.msk.bf16.vlgmr.msra.gmra.mrb[16].mxu1 %vm84_vm1, %v708_v50 }
 0x3dd   :  { %2217 = vmatpush3.bf16.msra.mxu1 %v2433_v4  ;;  %2220 = vmatprep.mubr.msk.bf16.mxu1 %vm2530_vm0, %v2529_v0 }
 0x3de   :  { %2218 = vmatprep.subr.bf16.mxu1 %v2529_v0 }
 0x3e1   :  { %2219 = vmatpush3.bf16.msra.mxu1 %v2434_v3 }
 0x3e4   :  { %2221 = vmatmul.mubr.msk.bf16.vlgmr.msra.gmra.mrb[20].mxu1 %vm84_vm1, %v708_v50 }
 0x3e5   :  { %2242 = vmatprep.mubr.msk.f32.mxu1 %vm292_vm3, %v2629_v44 }
 0x4a7   :  { %v763_v52 = vpop.f32.mrb[12].mxu1 }
 0x4a8   :  { %v2206_v53 = vpop.f32.mrb[13].mxu1 }
 0x4a9   :  { %v766_v54 = vpop.f32.mrb[14].mxu1 }
 0x4aa   :  { %v2207_v55 = vpop.f32.mrb[15].mxu1 }
 0x4af   :  { %v834_v57 = vpop.f32.mrb[16].mxu1 }
 0x4b0   :  { %v835_v58 = vadd.f32 %v2005_v56, %v834_v57  ;;  %v2214_v59 = vpop.f32.mrb[17].mxu1 }
 0x4b1   :  { %v837_v60 = vpop.f32.mrb[18].mxu1 }
 0x4b2   :  { %v2009_v61 = vmul.f32 -1.442695, %v835_v58  ;;  %v838_v63 = vadd.f32 %v2005_v56, %v837_v60  ;;  %v2215_v1 = vpop.f32.mrb[19].mxu1 }
 0x4b4   :  { %2455 = vpow2.f32 %v2009_v61  ;;  %v2010_v2 = vmul.f32 -1.442695, %v838_v63 }
 0x4b6   :  { %2457 = vpow2.f32 %v2010_v2 }
 0x4b7   :  { %v2688_v5 = vpop.f32.mrb[20].mxu1 }
 0x4b8   :  { %v2222_v6 = vpop.f32.mrb[21].mxu1  ;;  %v908_v50 = vadd.f32 %v2012_v46, %v2688_v5 }
 0x4b9   :  { %v910_v7 = vpop.f32.mrb[22].mxu1 }
 0x4ba   :  { %v2223_v8 = vpop.f32.mrb[23].mxu1  ;;  %v911_v49 = vadd.f32 %v2012_v46, %v910_v7  ;;  %v2016_v4 = vmul.f32 -1.442695, %v908_v50 }
 0x4bc   :  { %v2017_v51 = vmul.f32 -1.442695, %v911_v49 }
 0x4be   :  { %v2456_v11 = vpop.eup %2455 }
 0x4bf   :  { %v847_v13 = vadd.f32 1.0, %v2456_v11 }
 0x4c0   :  { %v2458_v15 = vpop.eup %2457 }
 0x4c1   :  { %2459 = vrcp.f32 %v847_v13  ;;  %v848_v16 = vadd.f32 1.0, %v2458_v15  ;;  %v1409_v15 = vadd.s32 4, %v2596_v9 }
 0x4c3   :  { %2461 = vrcp.f32 %v848_v16  ;;  %vm1410_vm8 = vcmp.eq.s32.totalorder %v2598_v10, %v1409_v15 }
 0x4c4   :  { %2463 = vpow2.f32 %v2017_v51 }
 0x4c5   :  { %2465 = vpow2.f32 %v2016_v4 }
 0x4cb   :  { %v2460_v17 = vpop.eup %2459 }
 0x4cc   :  { %v926_v18 = vsub.f32 1.0, %v2460_v17 }
 0x4cd   :  { %v2462_v19 = vpop.eup %2461 }
 0x4ce   :  { %v927_v20 = vsub.f32 1.0, %v2462_v19  ;;  %v928_v21 = vmul.f32 %v926_v18, %v763_v52  ;;  %v2355_v24 = vpack.c.bf16 %v2462_v19, %v2460_v17  ;;  %v2464_v3 = vpop.eup %2463  ;;  %v1412_v18 = vadd.s32 32, %v2596_v9 }
 0x4cf   :  { %v2466_v52 = vpop.eup %2465  ;;  %v921_v53 = vadd.f32 1.0, %v2464_v3 }
 0x4d0   :  { %v929_v22 = vmul.f32 %v927_v20, %v766_v54  ;;  %v920_v54 = vadd.f32 1.0, %v2466_v52  ;;  %v1413_v20 = vadd.s32 32, %v2613_v32  ;;  %vm1416_vm9 = vcmp.eq.s32.totalorder %v2598_v10, %v1412_v18 }
 0x4d1   :  { %2467 = vrcp.f32 %v921_v53 }
 0x4d2   :  { %v2351_v23 = vpack.c.bf16 %v929_v22, %v928_v21  ;;  %2469 = vrcp.f32 %v920_v54  ;;  %vm1417_vm10 = vcmp.eq.s32.totalorder %v2598_v10, %v1413_v20 }
 0x4d3   :  { %vm2378_vm12 = vmpackc.low %vm1417_vm10, %vm1416_vm9 }
 0x4d4   :  { %2352 = vmatprep.subr.bf16.mxu0 %v2351_v23 }
 0x4d5   :  { %2354 = vmatpush3.bf16.msra.mxu0 %v2351_v23 }
 0x4d6   :  { %2356 = vmatprep.subr.bf16.mxu0 %v2355_v24 }
 0x4d8   :  { %2229 = vmatmul.mubr.msk.f32.vlgmr.msra.gmra.mrb[12].mxu0 %vm292_vm3, %v2618_v42 }
 0x4d9   :  { %2358 = vmatpush3.bf16.msra.mxu0 %v2355_v24  ;;  %2235 = vmatprep.mubr.msk.f32.mxu0 %vm292_vm3, %v2603_v12 }
 0x4db   :  { %v2468_v1 = vpop.eup %2467 }
 0x4dc   :  { %2236 = vmatmul.mubr.msk.f32.vlgmr.msra.gmra.mrb[14].mxu0 %vm292_vm3, %v2618_v42  ;;  %v2470_v2 = vpop.eup %2469  ;;  %v931_v5 = vsub.f32 1.0, %v2468_v1 }
 0x4dd   :  { %2249 = vmatprep.mubr.msk.f32.mxu0 %vm292_vm3, %v2629_v44  ;;  %v930_v6 = vsub.f32 1.0, %v2470_v2 }
 0x4de   :  { %v933_v11 = vmul.f32 %v931_v5, %v2667_v47 }
 0x4df   :  { %v932_v16 = vmul.f32 %v930_v6, %v2669_v48 }
 0x5ab   :  { %v2230_v25 = vpop.f32.mrb[12].mxu0 }
 0x5ac   :  { %v1010_v26 = vmul.f32 %v2462_v19, %v2230_v25  ;;  %v1000_v27 = vpop.f32.mrb[13].mxu0  ;;  %v1411_v25 = vsel %vm1410_vm8, 1.0, %v2529_v0 }
 0x5ad   :  { %v1009_v28 = vmul.f32 %v2460_v17, %v1000_v27  ;;  %v1336_v27 = vsel %vm1333_vm11, 1.0, %v2529_v0 }
 0x5ae   :  { %v1012_v29 = vadd.f32 %v1010_v26, %v929_v22  ;;  %v2724_v22 = vadd.s32 24, %v2596_v9  ;;  %v1802_v26 = vadd.s32 12, %v2596_v9 }
 0x5af   :  { %v1011_v30 = vadd.f32 %v1009_v28, %v928_v21  ;;  %v2237_v31 = vpop.f32.mrb[14].mxu0  ;;  %v2721_v21 = vadd.s32 16, %v2596_v9  ;;  %v2532_v28 = vmov 1.0|1.0  }
 0x5b0   :  { %v1089_v33 = vmul.f32 %v2462_v19, %v2237_v31  ;;  %v1079_v34 = vpop.f32.mrb[15].mxu0  ;;  %v1415_v24 = vadd.s32 32, %v2724_v22  ;;  %vm1803_vm15 = vcmp.eq.s32.totalorder %v2598_v10, %v1802_v26  ;;  %vm1335_vm6 = vcmp.eq.s32.totalorder %v2598_v10, %v2724_v22 }
 0x5b1   :  { %v1088_v35 = vmul.f32 %v2460_v17, %v1079_v34  ;;  %v2359_v36 = vpack.c.bf16 %v1012_v29, %v1011_v30  ;;  %v1414_v48 = vadd.s32 32, %v2721_v21  ;;  %vm1334_vm5 = vcmp.eq.s32.totalorder %v2598_v10, %v2721_v21 }
 0x5b2   :  { %vm1419_vm14 = vcmp.eq.s32.totalorder %v2598_v10, %v1415_v24  ;;  %v1643_v31 = vadd.s32 64, %v2596_v9 }
 0x5b3   :  { %2360 = vmatprep.subr.bf16.mxu1 %v2359_v36  ;;  %v2363_v37 = vpack.c.bf16 %v1089_v33, %v1088_v35  ;;  %vm1418_vm13 = vcmp.eq.s32.totalorder %v2598_v10, %v1414_v48 }
 0x5b4   :  { %2362 = vmatpush3.bf16.msra.mxu1 %v2359_v36  ;;  %vm2381_vm2 = vmpackc.low %vm1419_vm14, %vm1418_vm13  ;;  %vm1647_vm7 = vcmp.eq.s32.totalorder %v2598_v10, %v1643_v31  ;;  %v1645_v36 = vadd.s32 64, %v2721_v21 }
 0x5b5   :  { %2364 = vmatprep.subr.bf16.mxu0 %v2363_v37 }
 0x5b6   :  { %2366 = vmatpush3.bf16.msra.mxu0 %v2363_v37  ;;  %v1646_v37 = vadd.s32 64, %v2724_v22  ;;  %vm1649_vm10 = vcmp.eq.s32.totalorder %v2598_v10, %v1645_v36 }
 0x5b7   :  { %2243 = vmatmul.mubr.msk.f32.vlgmr.msra.gmra.mrb[10].mxu1 %vm292_vm3, %v2638_v62 }
 0x5b8   :  { %2256 = vmatprep.mubr.f32.mxu1 %v2529_v0  ;;  %vm1650_vm11 = vcmp.eq.s32.totalorder %v2598_v10, %v1646_v37 }
 0x5b9   :  { %2250 = vmatmul.mubr.msk.f32.vlgmr.msra.gmra.mrb[16].mxu0 %vm292_vm3, %v2638_v62  ;;  %v2531_v62 = vmov 0.0|0.0  }
 0x5ba   :  { %2263 = vmatprep.mubr.msk.f32.mxu0 %vm2530_vm0, %v2529_v0  ;;  %2371 = vmatprep.subr.bf16.mxu0 %v2531_v62 }
 0x68a   :  { %v2244_v12 = vpop.f32.mrb[10].mxu1 }
 0x68b   :  { %v1166_v42 = vmul.f32 %v2244_v12, %v1089_v33  ;;  %v1156_v44 = vpop.f32.mrb[11].mxu1 }
 0x68c   :  { %v1165_v38 = vmul.f32 %v1156_v44, %v1088_v35  ;;  %v2251_v39 = vpop.f32.mrb[16].mxu0  ;;  %v1805_v44 = vadd.s32 96, %v2596_v9  ;;  %v1808_v9 = vadd.s32 96, %v2724_v22 }
 0x68d   :  { %v1168_v40 = vadd.f32 %v1166_v42, %v1012_v29  ;;  %v1235_v41 = vpop.f32.mrb[17].mxu0  ;;  %v1245_v55 = vmul.f32 %v2251_v39, %v1089_v33  ;;  %v1644_v33 = vadd.s32 64, %v2613_v32 }
 0x68e   :  { %v1167_v43 = vadd.f32 %v1165_v38, %v1011_v30  ;;  %v1244_v56 = vmul.f32 %v1235_v41, %v1088_v35  ;;  %v1806_v38 = vadd.s32 96, %v2613_v32  ;;  %vm1809_vm13 = vcmp.eq.s32.totalorder %v2598_v10, %v1805_v44 }
 0x68f   :  { %vm1648_vm8 = vcmp.eq.s32.totalorder %v2598_v10, %v1644_v33  ;;  %v1807_v41 = vadd.s32 96, %v2721_v21 }
 0x690   :  { %v2367_v45 = vpack.c.bf16 %v1168_v40, %v1167_v43  ;;  %vm2393_vm9 = vmpackc.low %vm1648_vm8, %vm1647_vm7  ;;  %vm1810_vm14 = vcmp.eq.s32.totalorder %v2598_v10, %v1806_v38 }
 0x692   :  { %2368 = vmatprep.subr.bf16.mxu1 %v2367_v45 }
 0x693   :  { %2370 = vmatpush3.bf16.msra.mxu1 %v2367_v45 }
 0x694   :  { %2374 = vmatprep.subr.bf16.mxu1 %v2531_v62 }
 0x696   :  { %2257 = vmatmul.mubr.msk.f32.vlgmr.msra.gmra.mrb[24].mxu1 %vm292_vm3, %v2654_v14 }
 0x697   :  { %2270 = vmatprep.mubr.msk.f32.mxu1 %vm2530_vm0, %v2529_v0 }
 0x769   :  { %v2258_v57 = vpop.f32.mrb[24].mxu1 }
 0x76a   :  { %v1322_v58 = vmul.f32 %v2258_v57, %v1245_v55  ;;  %v1312_v59 = vpop.f32.mrb[25].mxu1 }
 0x76b   :  { %v1321_v60 = vmul.f32 %v1312_v59, %v1244_v56 }
 0x76c   :  { %v1324_v61 = vadd.f32 %v1322_v58, %v1168_v40 }
 0x76d   :  { %v1323_v63 = vadd.f32 %v1321_v60, %v1167_v43 }
 0x76e   :  { %2471 = vtanh.f32 %v1324_v61 }
 0x76f   :  { %2473 = vtanh.f32 %v1323_v63 }
 0x778   :  { %v2472_v7 = vpop.eup %2471 }
 0x779   :  { %v2474_v8 = vpop.eup %2473  ;;  %v1328_v13 = vmul.f32 %v2472_v7, %v2468_v1 }
 0x77a   :  { %v1327_v17 = vmul.f32 %v2474_v8, %v2470_v2 }
 0x77b   :  { %v1330_v19 = vadd.f32 %v1328_v13, %v933_v11 }
 0x77c   :  { %v1329_v23 = vadd.f32 %v1327_v17, %v932_v16 }
 0x77e   :  { %v2372_v47 = vpack.c.bf16 %v1330_v19, %v1329_v23 }
 0x780   :  { %2373 = vmatpush3.bf16.msra.mxu0 %v2372_v47  ;;  %2376 = vmatpush3.bf16.msra.mxu1 %v2372_v47 }
 0x781   :  { %2389 = vmatprep.subr.bf16.mxu1 %v2531_v62  ;;  %2377 = vmatprep.subr.bf16.mxu0 %v2531_v62 }
 0x783   :  { %2271 = vmatmul.mubr.msk.f32.vlgmr.msra.gmra.mrb[26].mxu1 %vm292_vm3, %v1411_v25  ;;  %2264 = vmatmul.mubr.msk.f32.vlgmr.msra.gmra.mrb[18].mxu0 %vm292_vm3, %v2654_v14  ;;  %v1804_v14 = vsel %vm1803_vm15, 1.0, %v2529_v0  ;;  %vm2402_vm15 = vmpackc.low %vm1810_vm14, %vm1809_vm13 }
 0x784   :  { %2391 = vmatpush3.bf16.msra.mxu1 %v2372_v47  ;;  %2299 = vmatprep.mubr.msk.f32.mxu1 %vm2530_vm0, %v2529_v0 }
 0x785   :  { %2398 = vmatprep.subr.bf16.mxu1 %v2531_v62  ;;  %2379 = vmatpush3.bf16.msk.msra.mxu0 %vm2378_vm12, %v2532_v28  ;;  %vm2396_vm12 = vmpackc.low %vm1650_vm11, %vm1649_vm10 }
 0x786   :  { %2380 = vmatprep.subr.bf16.mxu0 %v2531_v62  ;;  %2281 = vmatprep.mubr.msk.f32.mxu0 %vm2530_vm0, %v2529_v0 }
 0x787   :  { %2300 = vmatmul.mubr.msk.f32.vlgmr.msra.gmra.mrb[28].mxu1 %vm292_vm3, %v1336_v27 }
 0x788   :  { %2400 = vmatpush3.bf16.msra.mxu1 %v2372_v47  ;;  %2317 = vmatprep.mubr.msk.f32.mxu1 %vm2530_vm0, %v2529_v0 }
 0x789   :  { %2382 = vmatpush3.bf16.msk.msra.mxu0 %vm2381_vm2, %v2532_v28  ;;  %vm1811_vm2 = vcmp.eq.s32.totalorder %v2598_v10, %v1807_v41 }
 0x78a   :  { %2383 = vmatprep.subr.bf16.mxu0 %v2531_v62 }
 0x78b   :  { %2318 = vmatmul.mubr.msk.f32.vlgmr.msra.gmra.mrb[30].mxu1 %vm292_vm3, %v1804_v14  ;;  %vm2387_vm3 = vmpackc.low %vm1335_vm6, %vm1334_vm5 }
 0x856   :  { %v1493_v29 = vpop.f32.mrb[26].mxu1  ;;  %v1405_v30 = vpop.f32.mrb[18].mxu0 }
 0x857   :  { %2282 = vmatmul.mubr.msk.f32.vlgmr.msra.gmra.mrb[20].mxu0 %vm84_vm1, %v1493_v29  ;;  %v2272_v34 = vpop.f32.mrb[27].mxu1  ;;  %v2265_v35 = vpop.f32.mrb[19].mxu0 }
 0x858   :  { %2385 = vmatpush3.bf16.msk.msra.mxu0 %vm2384_vm4, %v2532_v28  ;;  %2292 = vmatprep.mubr.msk.f32.mxu0 %vm2530_vm0, %v2529_v0  ;;  %vm1812_vm4 = vcmp.eq.s32.totalorder %v2598_v10, %v1808_v9 }
 0x859   :  { %2386 = vmatprep.subr.bf16.mxu0 %v2531_v62  ;;  %vm2405_vm5 = vmpackc.low %vm1812_vm4, %vm1811_vm2 }
 0x85a   :  { %v1724_v12 = vpop.f32.mrb[28].mxu1 }
 0x85b   :  { %v2301_v42 = vpop.f32.mrb[29].mxu1 }
 0x85c   :  { %2388 = vmatpush3.bf16.msk.msra.mxu0 %vm2387_vm3, %v2532_v28 }
 0x85d   :  { %2392 = vmatprep.subr.bf16.mxu0 %v2531_v62 }
 0x85e   :  { %v1886_v39 = vpop.f32.mrb[30].mxu1 }
 0x85f   :  { %2293 = vmatmul.mubr.msk.f32.vlgmr.msra.gmra.mrb[20].mxu0 %vm84_vm1, %v1405_v30  ;;  %v2319_v40 = vpop.f32.mrb[31].mxu1 }
 0x860   :  { %2394 = vmatpush3.bf16.msk.msra.mxu0 %vm2393_vm9, %v2532_v28  ;;  %2310 = vmatprep.mubr.msk.f32.mxu0 %vm2530_vm0, %v2529_v0 }
 0x861   :  { %2395 = vmatprep.subr.bf16.mxu0 %v2531_v62 }
 0x864   :  { %2397 = vmatpush3.bf16.msk.msra.mxu0 %vm2396_vm12, %v2532_v28 }
 0x865   :  { %2401 = vmatprep.subr.bf16.mxu0 %v2531_v62 }
 0x867   :  { %2311 = vmatmul.mubr.msk.f32.vlgmr.msra.gmra.mrb[20].mxu0 %vm84_vm1, %v1724_v12 }
 0x868   :  { %2403 = vmatpush3.bf16.msk.msra.mxu0 %vm2402_vm15, %v2532_v28  ;;  %2328 = vmatprep.mubr.msk.f32.mxu0 %vm2530_vm0, %v2529_v0 }
 0x869   :  { %2404 = vmatprep.subr.bf16.mxu0 %v2531_v62 }
 0x86c   :  { %2406 = vmatpush3.bf16.msk.msra.mxu0 %vm2405_vm5, %v2532_v28 }
 0x86f   :  { %2329 = vmatmul.mubr.msk.f32.vlgmr.msra.gmra.mrb[20].mxu0 %vm84_vm1, %v1886_v39 }
 0x942   :  { %v1959_v32 = vpop.f32.mrb[20].mxu0 }
 0x943   :  { %1964 = vst [vmem:[%s2806_s3] sm:$0xf] %v1959_v32  ;;  %v2330_v43 = vpop.f32.mrb[21].mxu0 }
 0x944   :  { %1969 = vsyncpa [#allocation3], 1 }
 0x945   :  { %1970 = vsyncpa [#allocation5], 1 }

</bundles_post_ra>
